<compile_context>
chip_gen: v7x
topology: tpu7x:2x2x1
jax: 0.10.0
libtpu: 0.0.40
codegen_flags: <defaults>
</compile_context>

<pallas_src>
import numpy as np
import jax
import jax.numpy as jnp
from jax.experimental import pallas as pl
from jax.experimental.pallas import tpu as pltpu


def _vmem_capacity_bytes() -> int:
    """Physical VMEM per TensorCore; falls back to the smallest (v7x) value."""
    try:
        cap = getattr(pltpu.get_tpu_info(), "vmem_capacity_bytes", None)
        if cap:
            return int(cap)
    except Exception:
        pass
    return 64 * 1024 * 1024


def _round_up(x: int, m: int) -> int:
    return ((x + m - 1) // m) * m


def _pick_tile_rows(total_rows: int, lane_w: int, itemsize: int, vmem_cap: int) -> int:
    """Rows per output block.

    The kernel is output-writeback bound, so the double-buffered output block
    gets ~1/8 of physical VMEM per buffer. Capped at 2048 rows (>=512 rows
    already reaches ~85% of HBM roofline; per-step overhead ~0.35 us). For
    non-trivial problems we force >= 2 grid steps so the "parallel" axis can be
    sharded across v7x's two TensorCores and DMA overlaps compute.
    """
    budget = vmem_cap // 8                      # per output buffer (x2 buffered)
    tn = max(8, min(2048, (budget // (lane_w * itemsize)) // 8 * 8))
    if total_rows >= 256:
        half = _round_up((total_rows + 1) // 2, 8)
        tn = min(tn, half)
    tn = min(tn, _round_up(total_rows, 8))
    return tn


def _make_dense_kernel(group: int):
    """Lane-dense kernel: each output row packs `group` positions x D features."""
    def kernel(pos_ref, tab_ref, out_ref):
        pos = pos_ref[...]                           # (TN, G) f32 positions
        tab = tab_ref[...]                           # (G+2, 128) resident table
        sel = tab[0:group, :]                        # one-hot lane-group selector
        wk = tab[group:group + 1, :]                 # (1, 128) tiled frequencies
        phase = tab[group + 1:group + 2, :]          # (1, 128) 0 / pi/2 per lane
        # Exact per-lane position expansion on the (otherwise idle) MXU:
        # pos_exp[r, l] = pos[r, l // D]. HIGHEST precision keeps this bit-exact
        # (one-hot RHS), so the zero gate below is exact.
        pos_exp = jax.lax.dot_general(
            pos, sel, (((1,), (0,)), ((), ())),
            precision=jax.lax.Precision.HIGHEST,
            preferred_element_type=jnp.float32)      # (TN, 128)
        # Single EUP transcendental: sin on even feature lanes, cos on odd ones
        # via the +pi/2 phase (f32 pi/2 -> ~6e-8 argument error, negligible).
        enc = jnp.sin(pos_exp * wk + phase)
        out_ref[...] = jnp.where(pos_exp != 0.0, enc, 0.0).astype(out_ref.dtype)
    return kernel


def _std_kernel(pos_ref, tab_ref, out_ref):
    pos = pos_ref[...]                               # (TN, 1) f32 positions
    tab = tab_ref[...]                               # (2, D) resident table
    wk = tab[0:1, :]
    phase = tab[1:2, :]
    enc = jnp.sin(pos * wk + phase)                  # (TN, D)
    out_ref[...] = jnp.where(pos != 0.0, enc, 0.0).astype(out_ref.dtype)


def pos_encoding_fix(positions: jax.Array, d_word_vec: int, *,
                     out_dtype=jnp.float32) -> jax.Array:
    """positions: 1-D array of positions (any numeric dtype). Returns (N, D).

    Pass out_dtype=jnp.bfloat16 when the encoding is added to bf16 activations
    to halve the (dominant) output writeback traffic.
    """
    n = int(positions.shape[0])
    d = int(d_word_vec)
    itemsize = jnp.dtype(out_dtype).itemsize

    # Deterministic "parameters", same formula as the module's __init__.
    idx = np.arange(d)
    w_k = (1.0 / np.power(10000.0, 2.0 * (idx // 2) / d)).astype(np.float32)
    phase = np.where(idx % 2 == 0, 0.0, np.pi / 2.0).astype(np.float32)

    vmem_cap = _vmem_capacity_bytes()
    dense = (d < 128) and (128 % d == 0)             # lane-dense output layout
    group = (128 // d) if dense else 1               # positions per output row
    lane_w = 128 if dense else d

    total_rows = (n + group - 1) // group
    tn = _pick_tile_rows(total_rows, lane_w, itemsize, vmem_cap)
    rows_pad = _round_up(total_rows, tn)
    grid = (rows_pad // tn,)
    n_pad = rows_pad * group

    pos_f32 = positions.astype(jnp.float32)
    if n_pad != n:
        pos_f32 = jnp.pad(pos_f32, (0, n_pad - n))   # pad positions = 0 -> zero rows

    if dense:
        sel = np.zeros((group, 128), np.float32)
        for g in range(group):
            sel[g, g * d:(g + 1) * d] = 1.0
        tab_np = np.concatenate(
            [sel, np.tile(w_k, group)[None, :], np.tile(phase, group)[None, :]],
            axis=0)                                  # (G+2, 128)
        pos_arr = pos_f32.reshape(rows_pad, group)
        kernel = _make_dense_kernel(group)
        pos_block = (tn, group)
        tab_block = tab_np.shape
    else:
        tab_np = np.stack([w_k, phase], axis=0)      # (2, D)
        pos_arr = pos_f32.reshape(rows_pad, 1)
        kernel = _std_kernel
        pos_block = (tn, 1)
        tab_block = tab_np.shape

    tab = jnp.asarray(tab_np)

    # Scoped-VMEM limit: enough for double-buffered blocks + table + headroom,
    # but well under physical VMEM on every generation (v5e/v6e 128 MiB, v7x 64).
    needed = (2 * (tn * lane_w * itemsize + tn * pos_block[1] * 4)
              + tab.size * 4 + (1 << 20))
    vmem_limit = int(min(vmem_cap * 3 // 4, max(2 * needed, 32 * 1024 * 1024)))

    out = pl.pallas_call(
        kernel,
        out_shape=jax.ShapeDtypeStruct((rows_pad, lane_w), out_dtype),
        grid=grid,
        in_specs=[
            pl.BlockSpec(pos_block, lambda i: (i, 0)),   # positions (row-tiled)
            pl.BlockSpec(tab_block, lambda i: (0, 0)),   # fused table (VMEM-resident)
        ],
        out_specs=pl.BlockSpec((tn, lane_w), lambda i: (i, 0)),
        compiler_params=pltpu.CompilerParams(
            dimension_semantics=("parallel",),
            vmem_limit_bytes=vmem_limit,
        ),
    )(pos_arr, tab)

    if dense:
        out = out.reshape(n_pad, d)
    return out[:n]


def _reference(positions: np.ndarray, d_word_vec: int) -> np.ndarray:
    i = np.arange(d_word_vec)
    w_k = 1.0 / np.power(10000.0, 2.0 * (i // 2) / d_word_vec)
    out = np.zeros((positions.shape[0], d_word_vec), dtype=np.float32)
    for r, p in enumerate(positions):
        if p != 0:
            ang = w_k * float(p)
            row = ang.copy()
            row[0::2] = np.sin(ang[0::2])
            row[1::2] = np.cos(ang[1::2])
            out[r] = row.astype(np.float32)
    return out


if __name__ == "__main__":
    key = jax.random.PRNGKey(0)
    k1, k2 = jax.random.split(key)

    # Lane-dense path (D < 128): D=32, seq=8, one forced zero position.
    d1, n1 = 32, 8
    pos1 = jax.random.randint(k1, (n1,), 0, 16, dtype=jnp.int32).at[3].set(0)
    out1 = jax.block_until_ready(pos_encoding_fix(pos1, d1))
    np.testing.assert_allclose(np.asarray(out1), _reference(np.asarray(pos1), d1),
                               rtol=1e-5, atol=1e-5)

    # Standard path (D >= 128, already lane-dense): D=256, seq=40.
    d2, n2 = 256, 40
    pos2 = jax.random.randint(k2, (n2,), 0, 16, dtype=jnp.int32).at[0].set(0)
    out2 = jax.block_until_ready(pos_encoding_fix(pos2, d2))
    np.testing.assert_allclose(np.asarray(out2), _reference(np.asarray(pos2), d2),
                               rtol=1e-5, atol=1e-5)

    print("KERNEL_OK")
</pallas_src>

<mosaic_0001>
module attributes {stable_mosaic.version = 11 : i64} {
  func.func @kernel(%arg0: i32, %arg1: memref<8x4xf32, #tpu.memory_space<vmem>>, %arg2: memref<6x128xf32, #tpu.memory_space<vmem>>, %arg3: memref<8x128xf32, #tpu.memory_space<vmem>>) attributes {dimension_semantics = [#tpu.dimension_semantics<parallel>], iteration_bounds = array<i64: 1>, scalar_prefetch = 0 : i64, scratch_operands = 0 : i64, tpu.core_type = #tpu.core_type<tc>, window_params = [{transform_indices = @transform_0, window_bounds = array<i64: 8, 4>}, {pipeline_mode = #tpu.pipeline_mode<synchronous>, transform_indices = @transform_1, window_bounds = array<i64: 6, 128>}, {transform_indices = @transform_2, window_bounds = array<i64: 8, 128>}]} {
    %c0 = arith.constant 0 : index
    %c0_0 = arith.constant 0 : index
    %0 = vector.load %arg1[%c0, %c0_0] : memref<8x4xf32, #tpu.memory_space<vmem>>, vector<8x4xf32>
    %c0_1 = arith.constant 0 : index
    %c0_2 = arith.constant 0 : index
    %1 = vector.load %arg2[%c0_1, %c0_2] : memref<6x128xf32, #tpu.memory_space<vmem>>, vector<6x128xf32>
    %2 = vector.extract_strided_slice %1 {offsets = [0, 0], sizes = [4, 128], strides = [1, 1]} : vector<6x128xf32> to vector<4x128xf32>
    %3 = vector.extract_strided_slice %1 {offsets = [4, 0], sizes = [1, 128], strides = [1, 1]} : vector<6x128xf32> to vector<1x128xf32>
    %4 = vector.extract_strided_slice %1 {offsets = [5, 0], sizes = [1, 128], strides = [1, 1]} : vector<6x128xf32> to vector<1x128xf32>
    %cst = arith.constant dense<0.000000e+00> : vector<8x128xf32>
    %5 = tpu.matmul %0, %2, %cst {dimension_numbers = #tpu.dot_dimension_numbers<[1], [0], [0], [1], [0, 0, 1, 1], [], []>, precision = #tpu.contract_precision<fp32>} : vector<8x4xf32>, vector<4x128xf32>, vector<8x128xf32> -> vector<8x128xf32>
    %6 = vector.broadcast %3 : vector<1x128xf32> to vector<8x128xf32>
    %7 = arith.mulf %5, %6 : vector<8x128xf32>
    %8 = vector.broadcast %4 : vector<1x128xf32> to vector<8x128xf32>
    %9 = arith.addf %7, %8 : vector<8x128xf32>
    %10 = math.sin %9 : vector<8x128xf32>
    %cst_3 = arith.constant 0.000000e+00 : f32
    %11 = vector.broadcast %cst_3 : f32 to vector<8x128xf32>
    %12 = arith.cmpf one, %5, %11 : vector<8x128xf32>
    %cst_4 = arith.constant 0.000000e+00 : f32
    %13 = vector.broadcast %cst_4 : f32 to vector<8x128xf32>
    %14 = arith.select %12, %10, %13 : vector<8x128xi1>, vector<8x128xf32>
    %c0_5 = arith.constant 0 : index
    %c0_6 = arith.constant 0 : index
    %15 = vector.load %arg3[%c0_5, %c0_6] : memref<8x128xf32, #tpu.memory_space<vmem>>, vector<8x128xf32>
    tpu.vector_store %arg3[%c0_5, %c0_6], %14 {strides = array<i32>} : memref<8x128xf32, #tpu.memory_space<vmem>>, vector<8x128xf32>,
    return
  }
  func.func @transform_0(%arg0: i32) -> (i32, i32) {
    %c0_i32 = arith.constant 0 : i32
    %c0_i32_0 = arith.constant 0 : i32
    return %arg0, %c0_i32 : i32, i32
  }
  func.func @transform_1(%arg0: i32) -> (i32, i32) {
    %c0_i32 = arith.constant 0 : i32
    %c0_i32_0 = arith.constant 0 : i32
    %c0_i32_1 = arith.constant 0 : i32
    return %c0_i32, %c0_i32_0 : i32, i32
  }
  func.func @transform_2(%arg0: i32) -> (i32, i32) {
    %c0_i32 = arith.constant 0 : i32
    %c0_i32_0 = arith.constant 0 : i32
    return %arg0, %c0_i32 : i32, i32
  }
}

</mosaic_0001>

<bundles_post_ra>
// kernel: tpu_custom_call.1
= control target key start
LH: loop header
LB: loop body
LE: loop exit
PB: predicated region body
PF: predicated region fallthrough
CT: control target
= control target key end

     0   :  { %vm18_vm0 = vcmask 1043456   ;;  %v695_v2 = vmov 0.0   ;;  %vm696_vm1 = vmmov 0   ;;  %vm14_vm2 = vcmask 31744   ;;  %s768_s0 = inlined_call_operand.vmem [shape: f32[8,4], index: 0, kind: input, shape index: {}]   ;;  %s769_s1 = inlined_call_operand.vmem [shape: f32[6,128], index: 1, kind: input, shape index: {}]   ;;  %s770_s2 = inlined_call_operand.hbm [shape: f32[8,128], index: 2, kind: output, shape index: {}]  }
   0x1   :  { %v13_v0 = vld [vmem:[%s769_s1] sm:$0x3f]  ;;  %630 = vmatprep.subr.mxu0 %v695_v2  ;;  %632 = vmatprep.mubr.msk.f32.mxu0 %vm696_vm1, %v695_v2 }
   0x2   :  { %v12_v1 = vld [vmem:[%s768_s0] sm:$0xff]  ;;  %v20_v3 = vsel %vm18_vm0, %v13_v0, 0 }
   0x3   :  { %7 = vsyncpa [#allocation3], 0  ;;  %v23_v4 = vand.u32 4294901760, %v20_v3  ;;  %v16_v5 = vsel %vm14_vm2, %v12_v1, 0  ;;  %615 = vmatprep.subr.mxu1 %v695_v2  ;;  %617 = vmatprep.mubr.msk.f32.mxu1 %vm696_vm1, %v695_v2  ;;  %v468_v15 = vlaneseq  ;;  %v697_v38 = vmov 683565275  }
   0x4   :  { %v88_v6 = vand.u32 4294901760, %v16_v5  ;;  %v698_v40 = vmov 2475754826   ;;  %v699_v43 = vmov 2131351028   ;;  %s703_s0 = smov [#allocation2]  }
   0x5   :  { %v100_v7 = vsub.f32 %v20_v3, %v23_v4  ;;  %631 = vmatpush3.msra.mxu0 %v23_v4  ;;  %616 = vmatpush3.msra.mxu1 %v23_v4  ;;  %v469_v16 = vshrl.u32 %v468_v15, 7  ;;  %v700_v46 = vmov 2102212464   ;;  %v701_v49 = vmov 920167782   ;;  %s591_s1 = sshll.u32 %s703_s0, 4  ;;  %s592_s1 = int_to_ptr.vmem [resolvable:$true] %s591_s1 }
   0x6   :  { %v89_v8 = vsub.f32 %v16_v5, %v88_v6  ;;  %620 = vmatprep.subr.mxu1 %v695_v2  ;;  %635 = vmatprep.subr.mxu0 %v695_v2  ;;  %v702_v52 = vmov 1326507024   ;;  %s671_s13 = scalar_lea.vmem %s592_s1, 128  ;;  %p676_p1 = scmp.lt.s32.totalorder %s592_s1, %s592_s1 }
   0x7   :  { %v101_v9 = vand.u32 4294901760, %v100_v7  ;;  %v470_v17 = vsub.s32 4, %v469_v16  ;;  %v475_v20 = vsub.s32 5, %v469_v16  ;;  %p672_p0 = scmp.ne.s32.totalorder %s592_s1, %s671_s13  ;;  %p677_p2 = scmp.lt.s32.totalorder %s671_s13, %s671_s13 }
   0x8   :  { %v90_v10 = vand.u32 4294901760, %v89_v8 }
   0x9   :  { %v102_v11 = vsub.f32 %v100_v7, %v101_v9  ;;  %v471_v21 = vrot.slane %v13_v0, %v470_v17  ;;  %v476_v24 = vrot.slane %v13_v0, %v475_v20  ;;  %p678_p3 = por %p677_p2, %p676_p1 }
   0xa   :  { %633 = vmatmul.mubr.f32.vlgmr.msra.gmra.mrb[0].mxu0 %v90_v10  ;;  %v91_v12 = vsub.f32 %v89_v8, %v90_v10 }
   0xb   :  { %v103_v13 = vand.u32 4294901760, %v102_v11  ;;  %636 = vmatpush3.msra.mxu0 %v101_v9  ;;  %637 = vmatprep.mubr.msk.f32.mxu0 %vm696_vm1, %v695_v2  ;;  %p679_p4 = pnand %p678_p3, %p672_p0 }
   0xc   :  { %v92_v14 = vand.u32 4294901760, %v91_v12  ;;  %640 = vmatprep.subr.mxu0 %v695_v2 }
   0xe   :  { %618 = vmatmul.mubr.f32.vlgmr.msra.gmra.mrb[0].mxu1 %v92_v14 }
   0xf   :  { %621 = vmatpush3.msra.mxu1 %v103_v13  ;;  %622 = vmatprep.mubr.msk.f32.mxu1 %vm696_vm1, %v695_v2 }
  0x10   :  { %625 = vmatprep.subr.mxu1 %v695_v2 }
  0x12   :  { %638 = vmatmul.mubr.f32.vlgmr.msra.gmra.mrb[0].mxu0 %v88_v6 }
  0x13   :  { %641 = vmatpush3.msra.mxu0 %v23_v4  ;;  %642 = vmatprep.mubr.msk.f32.mxu0 %vm696_vm1, %v695_v2 }
  0x16   :  { %623 = vmatmul.mubr.f32.vlgmr.msra.gmra.mrb[0].mxu1 %v88_v6 }
  0x17   :  { %626 = vmatpush3.msra.mxu1 %v100_v7  ;;  %627 = vmatprep.mubr.msk.f32.mxu1 %vm696_vm1, %v695_v2 }
  0x1a   :  { %643 = vmatmul.mubr.f32.vlgmr.msra.gmra.mrb[0].mxu0 %v88_v6 }
  0x1e   :  { %628 = vmatmul.mubr.f32.vlgmr.msra.gmra.mrb[0].mxu1 %v89_v8 }
  0xed   :  { %v464_v18 = vpop.f32.mrb[0].mxu0 }
  0xee   :  { %v644_v19 = vpop.f32.mrb[1].mxu0 }
  0xf1   :  { %v244_v22 = vpop.f32.mrb[0].mxu1 }
  0xf2   :  { %v731_v23 = vadd.f32 %v464_v18, %v244_v22  ;;  %v629_v25 = vpop.f32.mrb[1].mxu1 }
  0xf4   :  { %v472_v26 = vmul.f32 %v731_v23, %v471_v21  ;;  %vm582_vm0 = vcmp.ne.f32.partialorder %v731_v23, 0.0 }
  0xf6   :  { %v734_v27 = vadd.f32 %v476_v24, %v472_v26 }
  0xf8   :  { %v481_v28 = vand.u32 2139095040, %v734_v27  ;;  %v478_v32 = vand.u32 2147483647, %v734_v27  ;;  %vm480_vm10 = vcmp.lt.s32.totalorder %v734_v27, 0  ;;  %vm570_vm15 = vweird.f32 %v734_v27 }
  0xfa   :  { %v482_v29 = vshrl.u32 %v481_v28, 23  ;;  %v485_v36 = vand.u32 8388607, %v478_v32  ;;  %vm479_vm11 = vcmp.le.f32.partialorder %v478_v32, 0.7853982 }
  0xfc   :  { %v599_v30 = vadd.s32 4294967169, %v482_v29  ;;  %v486_v54 = vor.u32 8388608, %v485_v36 }
  0xfe   :  { %v488_v31 = vadd.s32 1, %v599_v30  ;;  %v526_v4 = vshll.u32 %v486_v54, 8 }
 0x100   :  { %vm489_vm3 = vcmp.gt.s32.totalorder %v488_v31, 0 }
 0x101   :  { %v490_v33 = vsel %vm489_vm3, %v488_v31, 0 }
 0x102   :  { %v492_v34 = vand.u32 31, %v490_v33  ;;  %v491_v37 = vshrl.u32 %v490_v33, 5 }
 0x104   :  { %v493_v35 = vsub.s32 32, %v492_v34  ;;  %v495_v39 = vshll.u32 %v697_v38, %v492_v34  ;;  %v498_v41 = vshll.u32 %v698_v40, %v492_v34  ;;  %v501_v45 = vshll.u32 %v699_v43, %v492_v34 }
 0x105   :  { %v504_v48 = vshll.u32 %v700_v46, %v492_v34  ;;  %v507_v51 = vshll.u32 %v701_v49, %v492_v34  ;;  %vm510_vm4 = vcmp.lt.s32.totalorder %v491_v37, 1  ;;  %vm513_vm5 = vcmp.lt.s32.totalorder %v491_v37, 4 }
 0x106   :  { %v496_v42 = vshrl.u32 %v698_v40, %v493_v35  ;;  %v499_v44 = vshrl.u32 %v699_v43, %v493_v35  ;;  %v502_v47 = vshrl.u32 %v700_v46, %v493_v35  ;;  %v505_v50 = vshrl.u32 %v701_v49, %v493_v35 }
 0x107   :  { %v508_v53 = vshrl.u32 %v702_v52, %v493_v35  ;;  %v494_v63 = vshrl.u32 %v697_v38, %v493_v35  ;;  %vm512_vm6 = vcmp.lt.s32.totalorder %v491_v37, 3  ;;  %vm511_vm7 = vcmp.lt.s32.totalorder %v491_v37, 2 }
 0x108   :  { %v497_v55 = vor.u32 %v496_v42, %v495_v39  ;;  %v500_v56 = vor.u32 %v499_v44, %v498_v41  ;;  %v503_v57 = vor.u32 %v502_v47, %v501_v45  ;;  %v506_v58 = vor.u32 %v505_v50, %v504_v48 }
 0x109   :  { %v509_v59 = vor.u32 %v508_v53, %v507_v51 }
 0x10a   :  { %v515_v60 = vsel %vm513_vm5, %v503_v57, 2102212464  ;;  %v518_v61 = vsel %vm510_vm4, %v497_v55, %v500_v56  ;;  %v522_v62 = vsel %vm510_vm4, %v500_v56, %v503_v57  ;;  %v519_v0 = vsel %vm513_vm5, %v506_v58, 920167782 }
 0x10b   :  { %v523_v1 = vsel %vm513_vm5, %v509_v59, 1326507024  ;;  %v520_v2 = vsel %vm512_vm6, %v503_v57, %v519_v0  ;;  %v514_v5 = vsel %vm510_vm4, %v494_v63, %v497_v55  ;;  %v516_v6 = vsel %vm512_vm6, %v500_v56, %v515_v60 }
 0x10c   :  { %v524_v3 = vsel %vm512_vm6, %v506_v58, %v523_v1  ;;  %v521_v7 = vsel %vm511_vm7, %v518_v61, %v520_v2  ;;  %v517_v13 = vsel %vm511_vm7, %v514_v5, %v516_v6 }
 0x10d   :  { %v525_v8 = vsel %vm511_vm7, %v522_v62, %v524_v3  ;;  %v743_v11 = vmul.u32.u64.low %v526_v4, %v521_v7  ;;  %v744_v12 = vmul.u32.u64.high %v526_v4, %v521_v7, %v743_v11  ;;  %v533_v15 = vmul.u32 %v526_v4, %v517_v13 }
 0x10e   :  { %v740_v9 = vmul.u32.u64.low %v526_v4, %v525_v8  ;;  %v741_v10 = vmul.u32.u64.high %v526_v4, %v525_v8, %v740_v9 }
 0x10f   :  { %v536_v14 = vadd.s32 1, %v744_v12 }
 0x110   :  { %vm535_vm8 = vc.u32 %v741_v10, %v743_v11  ;;  %v534_v29 = vadd.s32 %v743_v11, %v741_v10 }
 0x111   :  { %v537_v16 = vsel %vm535_vm8, %v536_v14, %v744_v12 }
 0x112   :  { %v538_v17 = vadd.s32 %v537_v16, %v533_v15 }
 0x114   :  { %v539_v18 = vadd.s32 536870912, %v538_v17 }
 0x116   :  { %v540_v19 = vshrl.u32 %v539_v18, 30 }
 0x118   :  { %v541_v20 = vshll.u32 %v540_v19, 30  ;;  %v564_v42 = vsub.s32 4, %v540_v19 }
 0x11a   :  { %v542_v21 = vsub.s32 %v538_v17, %v541_v20  ;;  %v565_v45 = vsel %vm480_vm10, %v564_v42, %v540_v19 }
 0x11b   :  { %v567_v47 = vsel %vm479_vm11, 0, %v565_v45 }
 0x11c   :  { %v544_v22 = vsub.s32 0, %v542_v21  ;;  %v571_v48 = vadd.s32 3, %v567_v47 }
 0x11e   :  { %v600_v24 = vmin.u32 %v544_v22, %v542_v21  ;;  %v572_v49 = vand.u32 3, %v571_v48 }
 0x120   :  { %v546_v25 = vclz %v600_v24  ;;  %vm577_vm12 = vcmp.eq.s32.totalorder %v572_v49, 2  ;;  %vm574_vm13 = vcmp.eq.s32.totalorder %v572_v49, 0  ;;  %vm573_vm14 = vcmp.lt.s32.totalorder %v572_v49, 2 }
 0x122   :  { %v601_v26 = vadd.s32 4294967294, %v546_v25 }
 0x124   :  { %vm602_vm9 = vcmp.lt.s32.totalorder %v601_v26, 0 }
 0x125   :  { %v549_v28 = vsel %vm602_vm9, 0, %v601_v26 }
 0x126   :  { %v550_v30 = vsub.s32 32, %v549_v28  ;;  %v554_v31 = vsub.s32 4294967266, %v549_v28  ;;  %v551_v33 = vshll.u32 %v542_v21, %v549_v28 }
 0x128   :  { %v552_v34 = vshrl.u32 %v534_v29, %v550_v30  ;;  %v555_v35 = vadd.s32 127, %v554_v31 }
 0x12a   :  { %v553_v36 = vor.u32 %v552_v34, %v551_v33  ;;  %v556_v37 = vshll.u32 %v555_v35, 23 }
 0x12c   :  { %v557_v38 = vor.u32 4788187, %v556_v37  ;;  %v560_v40 = vcvt.s32.f32 %v553_v36 }
 0x12e   :  { %v558_v39 = vand.u32 2147483647, %v557_v38 }
 0x130   :  { %v561_v41 = vmul.f32 %v560_v40, %v558_v39 }
 0x132   :  { %v562_v43 = vxor.u32 2147483648, %v561_v41 }
 0x134   :  { %v563_v44 = vsel %vm480_vm10, %v562_v43, %v561_v41 }
 0x135   :  { %v566_v46 = vsel %vm479_vm11, %v734_v27, %v563_v44 }
 0x136   :  { %667 = vcosq.f32 %v566_v46 }
 0x137   :  { %669 = vsinq.f32 %v566_v46 }
 0x140   :  { %v668_v50 = vpop.eup %667 }
 0x141   :  { %v670_v51 = vpop.eup %669  ;;  %v578_v52 = vxor.u32 2147483648, %v668_v50 }
 0x142   :  { %v575_v53 = vxor.u32 2147483648, %v670_v51 }
 0x143   :  { %v579_v54 = vsel %vm577_vm12, %v578_v52, %v670_v51 }
 0x144   :  { %v576_v32 = vsel %vm574_vm13, %v668_v50, %v575_v53 }
 0x145   :  { %v580_v55 = vsel %vm573_vm14, %v576_v32, %v579_v54 }
 0x146   :  { %v581_v56 = vsel %vm570_vm15, nan, %v580_v55 }
 0x147   :  { %v583_v57 = vsel %vm582_vm0, %v581_v56, 0.0 }
 0x148   :  { %584 = vst [vmem:[#allocation2] sm:$0xff] %v583_v57 }
 0x149   :  { %682 = shalt.err (!%p679_p4)
}
 0x14a   :  { %s683_s16 = scalar_lea.hbm %s770_s2, 128 }
 0x14b   :  { %p684_p5 = scmp.ne.s32.totalorder %s770_s2, %s683_s16  ;;  %p687_p6 = scmp.lt.u32.totalorder %s683_s16, %s770_s2 }
 0x14d   :  { %p689_p7 = pnand %p687_p6, %p684_p5 }
 0x14f   :  { %692 = shalt.err (!%p689_p7)
}
 0x150   :  { %594 = dma.vmem_to_hbm [thread:$0]  %s592_s1, 128, %s770_s2, [#allocation3]  }
 0x151   :  { %693 = dma.done.wait [#allocation3], 128  }
 0x152   :  { %694 = vsyncadd [#allocation3], 4294967168 }
 0x153   :  { %598 = vsyncpa [#allocation3], 1 }

</bundles_post_ra>
